<compile_context>
chip_gen: v7x
topology: tpu7x:2x2x1
jax: 0.10.0
libtpu: 0.0.40
codegen_flags: <defaults>
</compile_context>

<pallas_src>
import math

import jax
import jax.numpy as jnp
from jax.experimental import pallas as pl
from jax.experimental.pallas import tpu as pltpu

_LANE = 128
_NEG_BIG = -1e30  # finite "minus infinity" for padded class logits


def _round_up(x, m):
    return (x + m - 1) // m * m


def _min_sublane(dtype):
    # f32 -> 8 rows, bf16 -> 16, int8/fp8 -> 32 (sublane packing).
    return max(8, 32 // jnp.dtype(dtype).itemsize)


# --------------------------------------------------------------------------
# Kernel
# --------------------------------------------------------------------------
def classifier_kernel(x_ref, wt_ref, b_ref, o_ref):
    # x_ref: (TN, H)   wt_ref: (H, C_pad)   b_ref: (1, C_pad)   o_ref: (TN, C_pad)
    # Canonical [M,K]x[K,N] MXU matmul; operands feed the MXU in their native
    # dtype, accumulation in f32.
    logits = jnp.dot(x_ref[...], wt_ref[...], preferred_element_type=jnp.float32)
    logits = logits + b_ref[...].astype(jnp.float32)

    # Numerically-stable log_softmax with a minimal f32 live-set:
    # only `logits` (TN, C_pad) plus (TN, 1) vectors stay live.
    m = jnp.max(logits, axis=-1, keepdims=True)
    lse = m + jnp.log(jnp.sum(jnp.exp(logits - m), axis=-1, keepdims=True))
    o_ref[...] = (logits - lse).astype(o_ref.dtype)


# --------------------------------------------------------------------------
# Parameter preparation (one-time, outside the forward path)
# --------------------------------------------------------------------------
def prepare_classifier_params(weight, bias):
    """weight: [C, H] (PyTorch layout), bias: [C].

    Returns (w_t, b_pad):
      w_t   : [H, C_pad] — transposed once so the kernel does a plain MK x KN
              matmul (no per-grid-step transpose risk).
      b_pad : [1, C_pad] f32 — padded classes get a huge negative bias so they
              contribute exactly 0 to the log-sum-exp.
    """
    c, h = weight.shape
    c_pad = _round_up(max(c, _LANE), _LANE)
    w_t = jnp.zeros((h, c_pad), weight.dtype).at[:, :c].set(weight.T)
    b_pad = jnp.full((1, c_pad), _NEG_BIG, jnp.float32).at[0, :c].set(
        bias.astype(jnp.float32))
    return w_t, b_pad


# --------------------------------------------------------------------------
# VMEM budgeting
# --------------------------------------------------------------------------
def _vmem_limit_and_budget():
    """Per-generation VMEM limit + tile-picking budget (bytes)."""
    cap = None
    try:
        cap = getattr(pltpu.get_tpu_info(), "vmem_capacity_bytes", None)
    except Exception:
        cap = None
    if not cap:
        cap = 64 * 1024 * 1024  # conservative: v7x per-TC physical VMEM
    # Leave headroom for compiler-internal scratch: never request full capacity.
    limit = min(int(cap * 0.75), cap - 8 * 1024 * 1024)
    budget = int(limit * 0.8)
    return limit, budget


def _pick_row_tile(n, h, c_pad, x_bytes, w_bytes, out_bytes, *,
                   budget, w_buffers=1, x_buffers=2, min_tile=8):
    """Largest row tile whose buffered I/O + resident weight + f32 epilogue
    intermediates fit the per-generation VMEM budget."""
    resident = w_buffers * (c_pad * h * w_bytes + c_pad * 4)  # weight + bias
    if resident > budget:
        # TODO(synk): class-tiled online log-sum-exp path for weights that do
        # not fit VMEM (needed for LM-head-scale C*H, esp. on v7x).
        raise NotImplementedError(
            "Classifier weight does not fit VMEM; class-dim tiling not "
            "implemented yet (C_pad=%d, H=%d)." % (c_pad, h))
    n_cap = max(_round_up(n, min_tile), min_tile)
    # Prefer >=256-row tiles (full 256x256 MXU passes on v6e/v7x) when VMEM
    # allows; never pick a tile (much) larger than N itself.
    for tn in (2048, 1024, 512, 256, 128, 64, 32, 16, 8):
        if tn < min_tile or tn > n_cap:
            continue
        io = x_buffers * tn * h * x_bytes + 2 * tn * c_pad * out_bytes
        live = 2 * tn * c_pad * 4 + 4 * tn * 4  # logits + pre-cast output + vectors
        if resident + io + live <= budget:
            return tn
    return min_tile


# --------------------------------------------------------------------------
# pallas_call wrapper
# --------------------------------------------------------------------------
def _invariant_spec(shape, mode):
    if mode is None:
        return pl.BlockSpec(shape, lambda i: (0, 0))
    return pl.BlockSpec(shape, lambda i: (0, 0), pipeline_mode=mode)


def _call_kernel(x, w_t, b_pad, tn, vmem_limit, invariant_mode):
    n, h = x.shape
    c_pad = w_t.shape[1]
    x_bytes = jnp.dtype(x.dtype).itemsize
    grid = (pl.cdiv(n, tn),)  # ragged boundary block handled by Pallas masking

    cost = pl.CostEstimate(
        flops=2 * n * h * c_pad,
        transcendentals=n * c_pad,
        bytes_accessed=(n * h * x_bytes
                        + c_pad * h * jnp.dtype(w_t.dtype).itemsize
                        + c_pad * 4
                        + n * c_pad * x_bytes),
    )

    return pl.pallas_call(
        classifier_kernel,
        out_shape=jax.ShapeDtypeStruct((n, c_pad), x.dtype),
        grid_spec=pltpu.PrefetchScalarGridSpec(
            num_scalar_prefetch=0,
            grid=grid,
            in_specs=[
                pl.BlockSpec((tn, h), lambda i: (i, 0)),        # streamed row tile
                _invariant_spec((h, c_pad), invariant_mode),    # resident weight
                _invariant_spec((1, c_pad), invariant_mode),    # resident bias
            ],
            out_specs=pl.BlockSpec((tn, c_pad), lambda i: (i, 0)),
        ),
        compiler_params=pltpu.CompilerParams(
            dimension_semantics=("parallel",),
            vmem_limit_bytes=vmem_limit,
        ),
        cost_estimate=cost,
    )(x, w_t, b_pad)


def classifier_forward(features, w_t, b_pad, n_classes, *, trim=True):
    """features: [N, H]; w_t: [H, C_pad]; b_pad: [1, C_pad] (from
    prepare_classifier_params). Returns log_softmax(features @ W^T + b).

    trim=False skips the final [:N, :C] slice (saves a full HBM pass over the
    output) when the consumer can handle the padded [N, C_pad] layout.
    """
    n, h = features.shape
    c_pad = w_t.shape[1]
    x_bytes = jnp.dtype(features.dtype).itemsize
    w_bytes = jnp.dtype(w_t.dtype).itemsize
    min_tile = _min_sublane(features.dtype)
    vmem_limit, budget = _vmem_limit_and_budget()

    out = None
    last_err = None
    # Preferred: single-buffer the grid-invariant weight/bias (frees VMEM for a
    # bigger row tile). Fallback: default double-buffering if pipeline_mode is
    # unsupported by the running JAX version.
    for mode, w_buffers in ((pl.Buffered(1), 1), (None, 2)):
        tn = _pick_row_tile(n, h, c_pad, x_bytes, w_bytes, x_bytes,
                            budget=budget, w_buffers=w_buffers,
                            min_tile=min_tile)
        try:
            out = _call_kernel(features, w_t, b_pad, tn, vmem_limit, mode)
            break
        except NotImplementedError:
            raise
        except Exception as e:  # noqa: BLE001 - fall back to default buffering
            last_err = e
            out = None
    if out is None:
        raise last_err

    if trim:
        out = out[:n, :n_classes]
    return out


# --------------------------------------------------------------------------
# nn.Linear-style init (matches reset_parameters semantics)
# --------------------------------------------------------------------------
def init_linear_params(key, n_hidden, n_classes, dtype=jnp.float32):
    """kaiming_uniform(a=sqrt(5)) -> U(-1/sqrt(fan_in), 1/sqrt(fan_in)) for
    both weight and bias, mimicking nn.Linear.reset_parameters()."""
    kw, kb = jax.random.split(key)
    bound = 1.0 / math.sqrt(n_hidden)
    weight = jax.random.uniform(kw, (n_classes, n_hidden), dtype,
                                minval=-bound, maxval=bound)
    bias = jax.random.uniform(kb, (n_classes,), dtype,
                              minval=-bound, maxval=bound)
    return weight, bias


if __name__ == "__main__":
    key = jax.random.PRNGKey(0)
    k_feat, k_params = jax.random.split(key)

    n_nodes, n_hidden, n_classes = 8, 32, 16
    features = jax.random.normal(k_feat, (n_nodes, n_hidden), jnp.float32)
    weight, bias = init_linear_params(k_params, n_hidden, n_classes)

    # One-time parameter prep (transpose + lane-dense class padding).
    w_t, b_pad = prepare_classifier_params(weight, bias)

    out = classifier_forward(features, w_t, b_pad, n_classes)
    jax.block_until_ready(out)

    # Sanity check against plain-JAX reference.
    ref = jax.nn.log_softmax(features @ weight.T + bias, axis=-1)
    assert out.shape == (n_nodes, n_classes)
    assert jnp.allclose(out, ref, atol=1e-5, rtol=1e-5)

    print("KERNEL_OK")
</pallas_src>

<mosaic_0001>
module attributes {stable_mosaic.version = 11 : i64} {
  func.func @classifier_kernel(%arg0: i32, %arg1: memref<8x32xf32, #tpu.memory_space<vmem>>, %arg2: memref<32x128xf32, #tpu.memory_space<vmem>>, %arg3: memref<1x128xf32, #tpu.memory_space<vmem>>, %arg4: memref<8x128xf32, #tpu.memory_space<vmem>>) attributes {dimension_semantics = [#tpu.dimension_semantics<parallel>], iteration_bounds = array<i64: 1>, scalar_prefetch = 0 : i64, scratch_operands = 0 : i64, tpu.core_type = #tpu.core_type<tc>, window_params = [{transform_indices = @transform_0, window_bounds = array<i64: 8, 32>}, {pipeline_mode = #tpu.pipeline_mode<synchronous>, transform_indices = @transform_1, window_bounds = array<i64: 32, 128>}, {pipeline_mode = #tpu.pipeline_mode<synchronous>, transform_indices = @transform_2, window_bounds = array<i64: 1, 128>}, {transform_indices = @transform_3, window_bounds = array<i64: 8, 128>}]} {
    %c0 = arith.constant 0 : index
    %c0_0 = arith.constant 0 : index
    %0 = vector.load %arg1[%c0, %c0_0] : memref<8x32xf32, #tpu.memory_space<vmem>>, vector<8x32xf32>
    %c0_1 = arith.constant 0 : index
    %c0_2 = arith.constant 0 : index
    %1 = vector.load %arg2[%c0_1, %c0_2] : memref<32x128xf32, #tpu.memory_space<vmem>>, vector<32x128xf32>
    %cst = arith.constant dense<0.000000e+00> : vector<8x128xf32>
    %2 = tpu.matmul %0, %1, %cst {dimension_numbers = #tpu.dot_dimension_numbers<[1], [0], [0], [1], [0, 0, 1, 1], [], []>} : vector<8x32xf32>, vector<32x128xf32>, vector<8x128xf32> -> vector<8x128xf32>
    %c0_3 = arith.constant 0 : index
    %c0_4 = arith.constant 0 : index
    %3 = vector.load %arg3[%c0_3, %c0_4] : memref<1x128xf32, #tpu.memory_space<vmem>>, vector<1x128xf32>
    %4 = vector.broadcast %3 : vector<1x128xf32> to vector<8x128xf32>
    %5 = arith.addf %2, %4 : vector<8x128xf32>
    %cst_5 = arith.constant dense<0xFF800000> : vector<8xf32>
    %6 = vector.multi_reduction <maximumf>, %5, %cst_5 [1] : vector<8x128xf32> to vector<8xf32>
    %7 = vector.shape_cast %6 : vector<8xf32> to vector<8x1xf32>
    %8 = vector.broadcast %7 : vector<8x1xf32> to vector<8x128xf32>
    %9 = arith.subf %5, %8 : vector<8x128xf32>
    %10 = math.exp %9 : vector<8x128xf32>
    %cst_6 = arith.constant dense<0.000000e+00> : vector<8xf32>
    %11 = vector.multi_reduction <add>, %10, %cst_6 [1] : vector<8x128xf32> to vector<8xf32>
    %12 = vector.shape_cast %11 : vector<8xf32> to vector<8x1xf32>
    %13 = math.log %12 : vector<8x1xf32>
    %14 = arith.addf %7, %13 : vector<8x1xf32>
    %15 = vector.broadcast %14 : vector<8x1xf32> to vector<8x128xf32>
    %16 = arith.subf %5, %15 : vector<8x128xf32>
    %c0_7 = arith.constant 0 : index
    %c0_8 = arith.constant 0 : index
    %17 = vector.load %arg4[%c0_7, %c0_8] : memref<8x128xf32, #tpu.memory_space<vmem>>, vector<8x128xf32>
    tpu.vector_store %arg4[%c0_7, %c0_8], %16 {strides = array<i32>} : memref<8x128xf32, #tpu.memory_space<vmem>>, vector<8x128xf32>,
    return
  }
  func.func @transform_0(%arg0: i32) -> (i32, i32) {
    %c0_i32 = arith.constant 0 : i32
    %c0_i32_0 = arith.constant 0 : i32
    return %arg0, %c0_i32 : i32, i32
  }
  func.func @transform_1(%arg0: i32) -> (i32, i32) {
    %c0_i32 = arith.constant 0 : i32
    %c0_i32_0 = arith.constant 0 : i32
    %c0_i32_1 = arith.constant 0 : i32
    return %c0_i32, %c0_i32_0 : i32, i32
  }
  func.func @transform_2(%arg0: i32) -> (i32, i32) {
    %c0_i32 = arith.constant 0 : i32
    %c0_i32_0 = arith.constant 0 : i32
    %c0_i32_1 = arith.constant 0 : i32
    return %c0_i32, %c0_i32_0 : i32, i32
  }
  func.func @transform_3(%arg0: i32) -> (i32, i32) {
    %c0_i32 = arith.constant 0 : i32
    %c0_i32_0 = arith.constant 0 : i32
    return %arg0, %c0_i32 : i32, i32
  }
}

module attributes {stable_mosaic.version = 11 : i64} {
  func.func @classifier_kernel(%arg0: i32, %arg1: memref<8x32xf32, #tpu.memory_space<vmem>>, %arg2: memref<32x128xf32, #tpu.memory_space<vmem>>, %arg3: memref<1x128xf32, #tpu.memory_space<vmem>>, %arg4: memref<8x128xf32, #tpu.memory_space<vmem>>) attributes {dimension_semantics = [#tpu.dimension_semantics<parallel>], iteration_bounds = array<i64: 1>, scalar_prefetch = 0 : i64, scratch_operands = 0 : i64, tpu.core_type = #tpu.core_type<tc>, window_params = [{transform_indices = @transform_0, window_bounds = array<i64: 8, 32>}, {pipeline_mode = #tpu.pipeline_mode<synchronous>, transform_indices = @transform_1, window_bounds = array<i64: 32, 128>}, {pipeline_mode = #tpu.pipeline_mode<synchronous>, transform_indices = @transform_2, window_bounds = array<i64: 1, 128>}, {transform_indices = @transform_3, window_bounds = array<i64: 8, 128>}]} {
    %c0 = arith.constant 0 : index
    %c0_0 = arith.constant 0 : index
    %0 = vector.load %arg1[%c0, %c0_0] : memref<8x32xf32, #tpu.memory_space<vmem>>, vector<8x32xf32>
    %c0_1 = arith.constant 0 : index
    %c0_2 = arith.constant 0 : index
    %1 = vector.load %arg2[%c0_1, %c0_2] : memref<32x128xf32, #tpu.memory_space<vmem>>, vector<32x128xf32>
    %cst = arith.constant dense<0.000000e+00> : vector<8x128xf32>
    %2 = tpu.matmul %0, %1, %cst {dimension_numbers = #tpu.dot_dimension_numbers<[1], [0], [0], [1], [0, 0, 1, 1], [], []>} : vector<8x32xf32>, vector<32x128xf32>, vector<8x128xf32> -> vector<8x128xf32>
    %c0_3 = arith.constant 0 : index
    %c0_4 = arith.constant 0 : index
    %3 = vector.load %arg3[%c0_3, %c0_4] : memref<1x128xf32, #tpu.memory_space<vmem>>, vector<1x128xf32>
    %4 = vector.broadcast %3 : vector<1x128xf32> to vector<8x128xf32>
    %5 = arith.addf %2, %4 : vector<8x128xf32>
    %cst_5 = arith.constant dense<0xFF800000> : vector<8xf32>
    %6 = vector.multi_reduction <maximumf>, %5, %cst_5 [1] : vector<8x128xf32> to vector<8xf32>
    %7 = vector.shape_cast %6 : vector<8xf32> to vector<8x1xf32>
    %8 = vector.broadcast %7 : vector<8x1xf32> to vector<8x128xf32>
    %9 = arith.subf %5, %8 : vector<8x128xf32>
    %10 = math.exp %9 : vector<8x128xf32>
    %cst_6 = arith.constant dense<0.000000e+00> : vector<8xf32>
    %11 = vector.multi_reduction <add>, %10, %cst_6 [1] : vector<8x128xf32> to vector<8xf32>
    %12 = vector.shape_cast %11 : vector<8xf32> to vector<8x1xf32>
    %13 = math.log %12 : vector<8x1xf32>
    %14 = arith.addf %7, %13 : vector<8x1xf32>
    %15 = vector.broadcast %14 : vector<8x1xf32> to vector<8x128xf32>
    %16 = arith.subf %5, %15 : vector<8x128xf32>
    %c0_7 = arith.constant 0 : index
    %c0_8 = arith.constant 0 : index
    %17 = vector.load %arg4[%c0_7, %c0_8] : memref<8x128xf32, #tpu.memory_space<vmem>>, vector<8x128xf32>
    tpu.vector_store %arg4[%c0_7, %c0_8], %16 {strides = array<i32>} : memref<8x128xf32, #tpu.memory_space<vmem>>, vector<8x128xf32>,
    return
  }
  func.func @transform_0(%arg0: i32) -> (i32, i32) {
    %c0_i32 = arith.constant 0 : i32
    %c0_i32_0 = arith.constant 0 : i32
    return %arg0, %c0_i32 : i32, i32
  }
  func.func @transform_1(%arg0: i32) -> (i32, i32) {
    %c0_i32 = arith.constant 0 : i32
    %c0_i32_0 = arith.constant 0 : i32
    %c0_i32_1 = arith.constant 0 : i32
    return %c0_i32, %c0_i32_0 : i32, i32
  }
  func.func @transform_2(%arg0: i32) -> (i32, i32) {
    %c0_i32 = arith.constant 0 : i32
    %c0_i32_0 = arith.constant 0 : i32
    %c0_i32_1 = arith.constant 0 : i32
    return %c0_i32, %c0_i32_0 : i32, i32
  }
  func.func @transform_3(%arg0: i32) -> (i32, i32) {
    %c0_i32 = arith.constant 0 : i32
    %c0_i32_0 = arith.constant 0 : i32
    return %arg0, %c0_i32 : i32, i32
  }
}

</mosaic_0001>

<bundles_post_ra>
// kernel: tpu_custom_call.1
= control target key start
LH: loop header
LB: loop body
LE: loop exit
PB: predicated region body
PF: predicated region fallthrough
CT: control target
= control target key end

     0   :  { %8 = vsyncpa [#allocation3], 0  ;;  %s337_s0 = inlined_call_operand.hbm [shape: f32[8,32], index: 0, kind: input, shape index: {}]   ;;  %s338_s1 = inlined_call_operand.hbm [shape: f32[32,128], index: 1, kind: input, shape index: {}]   ;;  %s339_s2 = inlined_call_operand.vmem [shape: f32[1,128], index: 2, kind: input, shape index: {}]   ;;  %s340_s3 = inlined_call_operand.hbm [shape: f32[8,128], index: 3, kind: output, shape index: {}]  }
   0x1   :  { %9 = vsyncpa [#allocation6], 0 }
   0x2   :  { %10 = vsyncpa [#allocation4], 0  ;;  %s263_s12 = smov [#allocation2]   ;;  %s264_s14 = smov [#allocation5]  }
   0x3   :  { %s17_s13 = sshll.u32 %s263_s12, 4  ;;  %s26_s15 = sshll.u32 %s264_s14, 4  ;;  %s18_s13 = int_to_ptr.vmem [resolvable:$true] %s17_s13  ;;  %s291_s15 = int_to_ptr.vmem [resolvable:$true] %s26_s15 }
   0x4   :  { %s191_s18 = scalar_lea.hbm %s337_s0, 128 }
   0x5   :  { %p192_p0 = scmp.ne.s32.totalorder %s337_s0, %s191_s18  ;;  %p195_p1 = scmp.lt.u32.totalorder %s191_s18, %s337_s0 }
   0x7   :  { %p197_p2 = pnand %p195_p1, %p192_p0 }
   0x9   :  { %200 = shalt.err (!%p197_p2)
}
   0xa   :  { %s201_s23 = scalar_lea.vmem %s18_s13, 128  ;;  %p206_p4 = scmp.lt.s32.totalorder %s18_s13, %s18_s13 }
   0xb   :  { %p202_p3 = scmp.ne.s32.totalorder %s18_s13, %s201_s23  ;;  %p207_p5 = scmp.lt.s32.totalorder %s201_s23, %s201_s23 }
   0xd   :  { %p208_p6 = por %p207_p5, %p206_p4 }
   0xf   :  { %p209_p7 = pnand %p208_p6, %p202_p3 }
  0x11   :  { %212 = shalt.err (!%p209_p7)
}
  0x12   :  { %20 = dma.hbm_to_vmem [thread:$0]  %s337_s0, 128, %s18_s13, [#allocation3]  }
  0x13   :  { %s213_s28 = scalar_lea.hbm %s338_s1, 512 }
  0x14   :  { %p214_p8 = scmp.ne.s32.totalorder %s338_s1, %s213_s28  ;;  %p217_p9 = scmp.lt.u32.totalorder %s213_s28, %s338_s1 }
  0x16   :  { %p219_p10 = pnand %p217_p9, %p214_p8 }
  0x18   :  { %222 = shalt.err (!%p219_p10)
}
  0x19   :  { %s223_s6 = scalar_lea.vmem %s291_s15, 512  ;;  %p228_p12 = scmp.lt.s32.totalorder %s291_s15, %s291_s15 }
  0x1a   :  { %p224_p11 = scmp.ne.s32.totalorder %s291_s15, %s223_s6  ;;  %p229_p13 = scmp.lt.s32.totalorder %s223_s6, %s223_s6 }
  0x1c   :  { %p230_p0 = por %p229_p13, %p228_p12 }
  0x1e   :  { %p231_p1 = pnand %p230_p0, %p224_p11 }
  0x20   :  { %234 = shalt.err (!%p231_p1)
}
  0x21   :  { %s265_s0 = smov 128   ;;  %s266_s7 = smov 8  }
  0x22   :  { %32 = dma.hbm_to_vmem [thread:$0]  %s338_s1, 512, %s291_s15, [#allocation6], %s265_s0, %s265_s0, %s266_s7  }
  0x23   :  { %257 = dma.done.wait [#allocation3], 128  }
  0x24   :  { %258 = vsyncadd [#allocation3], 4294967168 }
  0x25   :  { %259 = dma.done.wait [#allocation6], 512  }
  0x26   :  { %260 = vsyncadd [#allocation6], 4294966784  ;;  %v267_v0 = vmov 0.0|0.0   ;;  %vm268_vm0 = vmmov 0   ;;  %v269_v1 = vmov 0.0   ;;  %v42_v2 = vld [vmem:[#allocation5] sm:$0xff] }
  0x27   :  { %173 = vmatprep.subr.bf16.mxu0 %v267_v0  ;;  %170 = vmatprep.mubr.msk.f32.mxu0 %vm268_vm0, %v269_v1  ;;  %v43_v3 = vld [vmem:[#allocation5 + $0x8] sm:$0xff]  ;;  %v44_v4 = vld [vmem:[#allocation5 + $0x10] sm:$0xff]  ;;  %v45_v6 = vld [vmem:[#allocation5 + $0x18] sm:$0xff]  ;;  %vm53_vm1 = vcmask 261120   ;;  %s270_s11 = smov [#allocation7]  }
  0x28   :  { %v174_v5 = vpack.c.bf16 %v43_v3, %v42_v2  ;;  %v177_v7 = vpack.c.bf16 %v45_v6, %v44_v4  ;;  %v41_v8 = vld [vmem:[#allocation2] sm:$0xff]  ;;  %s145_s12 = sshll.u32 %s270_s11, 4  ;;  %s146_s12 = int_to_ptr.vmem [resolvable:$true] %s145_s12 }
  0x29   :  { %v155_v9 = vld [vmem:[%s339_s2] ss:$0 sm:$0xff]  ;;  %s235_s2 = scalar_lea.vmem %s146_s12, 128  ;;  %p240_p3 = scmp.lt.s32.totalorder %s146_s12, %s146_s12 }
  0x2a   :  { %175 = vmatpush3.bf16.msra.mxu0 %v174_v5  ;;  %p236_p2 = scmp.ne.s32.totalorder %s146_s12, %s235_s2  ;;  %p241_p4 = scmp.lt.s32.totalorder %s235_s2, %s235_s2 }
  0x2b   :  { %176 = vmatprep.subr.bf16.mxu0 %v267_v0 }
  0x2c   :  { %p242_p5 = por %p241_p4, %p240_p3 }
  0x2e   :  { %178 = vmatpush3.bf16.msra.mxu0 %v177_v7  ;;  %p243_p6 = pnand %p242_p5, %p236_p2 }
  0x31   :  { %171 = vmatmul.mubr.msk.f32.vlgmr.msra.gmra.mrb[0].mxu0 %vm53_vm1, %v41_v8 }
 0x104   :  { %v123_v10 = vpop.f32.mrb[0].mxu0 }
 0x105   :  { %v124_v11 = vadd.f32 %v155_v9, %v123_v10  ;;  %v172_v12 = vpop.f32.mrb[1].mxu0 }
 0x107   :  { %127 = vmax.xlane.f32.xlu0 %v124_v11 }
 0x194   :  { %v128_v13 = vpop.xlane.xlu0 %127 }
 0x195   :  { %v129_v14 = vsub.f32 %v124_v11, %v128_v13 }
 0x197   :  { %v130_v15 = vmul.f32 1.442695, %v129_v14 }
 0x199   :  { %187 = vpow2.f32 %v130_v15 }
 0x1a3   :  { %v188_v16 = vpop.eup %187 }
 0x1a4   :  { %132 = vadd.xlane.f32.xlu0 %v188_v16 }
 0x231   :  { %v133_v17 = vpop.xlane.xlu0 %132 }
 0x232   :  { %189 = vlog2.f32 %v133_v17 }
 0x23c   :  { %v190_v18 = vpop.eup %189 }
 0x23d   :  { %v135_v19 = vmul.f32 0.6931472, %v190_v18 }
 0x23f   :  { %v136_v20 = vadd.f32 %v135_v19, %v128_v13 }
 0x241   :  { %v137_v21 = vsub.f32 %v124_v11, %v136_v20 }
 0x243   :  { %138 = vst [vmem:[#allocation7] sm:$0xff] %v137_v21 }
 0x244   :  { %246 = shalt.err (!%p243_p6)
}
 0x245   :  { %s247_s15 = scalar_lea.hbm %s340_s3, 128 }
 0x246   :  { %p248_p7 = scmp.ne.s32.totalorder %s340_s3, %s247_s15  ;;  %p251_p8 = scmp.lt.u32.totalorder %s247_s15, %s340_s3 }
 0x248   :  { %p253_p9 = pnand %p251_p8, %p248_p7 }
 0x24a   :  { %256 = shalt.err (!%p253_p9)
}
 0x24b   :  { %148 = dma.vmem_to_hbm [thread:$0]  %s146_s12, 128, %s340_s3, [#allocation4]  }
 0x24c   :  { %261 = dma.done.wait [#allocation4], 128  }
 0x24d   :  { %262 = vsyncadd [#allocation4], 4294967168 }
 0x24e   :  { %152 = vsyncpa [#allocation3], 1 }
 0x24f   :  { %153 = vsyncpa [#allocation6], 1 }
 0x250   :  { %154 = vsyncpa [#allocation4], 1 }

// kernel: tpu_custom_call.1
= control target key start
LH: loop header
LB: loop body
LE: loop exit
PB: predicated region body
PF: predicated region fallthrough
CT: control target
= control target key end

     0   :  { %8 = vsyncpa [#allocation3], 0  ;;  %s337_s0 = inlined_call_operand.hbm [shape: f32[8,32], index: 0, kind: input, shape index: {}]   ;;  %s338_s1 = inlined_call_operand.hbm [shape: f32[32,128], index: 1, kind: input, shape index: {}]   ;;  %s339_s2 = inlined_call_operand.vmem [shape: f32[1,128], index: 2, kind: input, shape index: {}]   ;;  %s340_s3 = inlined_call_operand.hbm [shape: f32[8,128], index: 3, kind: output, shape index: {}]  }
   0x1   :  { %9 = vsyncpa [#allocation6], 0 }
   0x2   :  { %10 = vsyncpa [#allocation4], 0  ;;  %s263_s12 = smov [#allocation2]   ;;  %s264_s14 = smov [#allocation5]  }
   0x3   :  { %s17_s13 = sshll.u32 %s263_s12, 4  ;;  %s26_s15 = sshll.u32 %s264_s14, 4  ;;  %s18_s13 = int_to_ptr.vmem [resolvable:$true] %s17_s13  ;;  %s291_s15 = int_to_ptr.vmem [resolvable:$true] %s26_s15 }
   0x4   :  { %s191_s18 = scalar_lea.hbm %s337_s0, 128 }
   0x5   :  { %p192_p0 = scmp.ne.s32.totalorder %s337_s0, %s191_s18  ;;  %p195_p1 = scmp.lt.u32.totalorder %s191_s18, %s337_s0 }
   0x7   :  { %p197_p2 = pnand %p195_p1, %p192_p0 }
   0x9   :  { %200 = shalt.err (!%p197_p2)
}
   0xa   :  { %s201_s23 = scalar_lea.vmem %s18_s13, 128  ;;  %p206_p4 = scmp.lt.s32.totalorder %s18_s13, %s18_s13 }
   0xb   :  { %p202_p3 = scmp.ne.s32.totalorder %s18_s13, %s201_s23  ;;  %p207_p5 = scmp.lt.s32.totalorder %s201_s23, %s201_s23 }
   0xd   :  { %p208_p6 = por %p207_p5, %p206_p4 }
   0xf   :  { %p209_p7 = pnand %p208_p6, %p202_p3 }
  0x11   :  { %212 = shalt.err (!%p209_p7)
}
  0x12   :  { %20 = dma.hbm_to_vmem [thread:$0]  %s337_s0, 128, %s18_s13, [#allocation3]  }
  0x13   :  { %s213_s28 = scalar_lea.hbm %s338_s1, 512 }
  0x14   :  { %p214_p8 = scmp.ne.s32.totalorder %s338_s1, %s213_s28  ;;  %p217_p9 = scmp.lt.u32.totalorder %s213_s28, %s338_s1 }
  0x16   :  { %p219_p10 = pnand %p217_p9, %p214_p8 }
  0x18   :  { %222 = shalt.err (!%p219_p10)
}
  0x19   :  { %s223_s6 = scalar_lea.vmem %s291_s15, 512  ;;  %p228_p12 = scmp.lt.s32.totalorder %s291_s15, %s291_s15 }
  0x1a   :  { %p224_p11 = scmp.ne.s32.totalorder %s291_s15, %s223_s6  ;;  %p229_p13 = scmp.lt.s32.totalorder %s223_s6, %s223_s6 }
  0x1c   :  { %p230_p0 = por %p229_p13, %p228_p12 }
  0x1e   :  { %p231_p1 = pnand %p230_p0, %p224_p11 }
  0x20   :  { %234 = shalt.err (!%p231_p1)
}
  0x21   :  { %s265_s0 = smov 128   ;;  %s266_s7 = smov 8  }
  0x22   :  { %32 = dma.hbm_to_vmem [thread:$0]  %s338_s1, 512, %s291_s15, [#allocation6], %s265_s0, %s265_s0, %s266_s7  }
  0x23   :  { %257 = dma.done.wait [#allocation3], 128  }
  0x24   :  { %258 = vsyncadd [#allocation3], 4294967168 }
  0x25   :  { %259 = dma.done.wait [#allocation6], 512  }
  0x26   :  { %260 = vsyncadd [#allocation6], 4294966784  ;;  %v267_v0 = vmov 0.0|0.0   ;;  %vm268_vm0 = vmmov 0   ;;  %v269_v1 = vmov 0.0   ;;  %v42_v2 = vld [vmem:[#allocation5] sm:$0xff] }
  0x27   :  { %173 = vmatprep.subr.bf16.mxu0 %v267_v0  ;;  %170 = vmatprep.mubr.msk.f32.mxu0 %vm268_vm0, %v269_v1  ;;  %v43_v3 = vld [vmem:[#allocation5 + $0x8] sm:$0xff]  ;;  %v44_v4 = vld [vmem:[#allocation5 + $0x10] sm:$0xff]  ;;  %v45_v6 = vld [vmem:[#allocation5 + $0x18] sm:$0xff]  ;;  %vm53_vm1 = vcmask 261120   ;;  %s270_s11 = smov [#allocation7]  }
  0x28   :  { %v174_v5 = vpack.c.bf16 %v43_v3, %v42_v2  ;;  %v177_v7 = vpack.c.bf16 %v45_v6, %v44_v4  ;;  %v41_v8 = vld [vmem:[#allocation2] sm:$0xff]  ;;  %s145_s12 = sshll.u32 %s270_s11, 4  ;;  %s146_s12 = int_to_ptr.vmem [resolvable:$true] %s145_s12 }
  0x29   :  { %v155_v9 = vld [vmem:[%s339_s2] ss:$0 sm:$0xff]  ;;  %s235_s2 = scalar_lea.vmem %s146_s12, 128  ;;  %p240_p3 = scmp.lt.s32.totalorder %s146_s12, %s146_s12 }
  0x2a   :  { %175 = vmatpush3.bf16.msra.mxu0 %v174_v5  ;;  %p236_p2 = scmp.ne.s32.totalorder %s146_s12, %s235_s2  ;;  %p241_p4 = scmp.lt.s32.totalorder %s235_s2, %s235_s2 }
  0x2b   :  { %176 = vmatprep.subr.bf16.mxu0 %v267_v0 }
  0x2c   :  { %p242_p5 = por %p241_p4, %p240_p3 }
  0x2e   :  { %178 = vmatpush3.bf16.msra.mxu0 %v177_v7  ;;  %p243_p6 = pnand %p242_p5, %p236_p2 }
  0x31   :  { %171 = vmatmul.mubr.msk.f32.vlgmr.msra.gmra.mrb[0].mxu0 %vm53_vm1, %v41_v8 }
 0x104   :  { %v123_v10 = vpop.f32.mrb[0].mxu0 }
 0x105   :  { %v124_v11 = vadd.f32 %v155_v9, %v123_v10  ;;  %v172_v12 = vpop.f32.mrb[1].mxu0 }
 0x107   :  { %127 = vmax.xlane.f32.xlu0 %v124_v11 }
 0x194   :  { %v128_v13 = vpop.xlane.xlu0 %127 }
 0x195   :  { %v129_v14 = vsub.f32 %v124_v11, %v128_v13 }
 0x197   :  { %v130_v15 = vmul.f32 1.442695, %v129_v14 }
 0x199   :  { %187 = vpow2.f32 %v130_v15 }
 0x1a3   :  { %v188_v16 = vpop.eup %187 }
 0x1a4   :  { %132 = vadd.xlane.f32.xlu0 %v188_v16 }
 0x231   :  { %v133_v17 = vpop.xlane.xlu0 %132 }
 0x232   :  { %189 = vlog2.f32 %v133_v17 }
 0x23c   :  { %v190_v18 = vpop.eup %189 }
 0x23d   :  { %v135_v19 = vmul.f32 0.6931472, %v190_v18 }
 0x23f   :  { %v136_v20 = vadd.f32 %v135_v19, %v128_v13 }
 0x241   :  { %v137_v21 = vsub.f32 %v124_v11, %v136_v20 }
 0x243   :  { %138 = vst [vmem:[#allocation7] sm:$0xff] %v137_v21 }
 0x244   :  { %246 = shalt.err (!%p243_p6)
}
 0x245   :  { %s247_s15 = scalar_lea.hbm %s340_s3, 128 }
 0x246   :  { %p248_p7 = scmp.ne.s32.totalorder %s340_s3, %s247_s15  ;;  %p251_p8 = scmp.lt.u32.totalorder %s247_s15, %s340_s3 }
 0x248   :  { %p253_p9 = pnand %p251_p8, %p248_p7 }
 0x24a   :  { %256 = shalt.err (!%p253_p9)
}
 0x24b   :  { %148 = dma.vmem_to_hbm [thread:$0]  %s146_s12, 128, %s340_s3, [#allocation4]  }
 0x24c   :  { %261 = dma.done.wait [#allocation4], 128  }
 0x24d   :  { %262 = vsyncadd [#allocation4], 4294967168 }
 0x24e   :  { %152 = vsyncpa [#allocation3], 1 }
 0x24f   :  { %153 = vsyncpa [#allocation6], 1 }
 0x250   :  { %154 = vsyncpa [#allocation4], 1 }

</bundles_post_ra>
